<compile_context>
chip_gen: v6e
topology: v6e:2x2x1
jax: 0.10.0
libtpu: 0.0.40
codegen_flags: <defaults>
</compile_context>

<pallas_src>
import functools

import jax
import jax.numpy as jnp
from jax.experimental import pallas as pl
from jax.experimental.pallas import tpu as pltpu


def _vmem_sizes():
    """Returns (tile-sizing budget bytes, vmem_limit_bytes) for this chip."""
    cap = None
    try:
        cap = getattr(pltpu.get_tpu_info(), "vmem_capacity_bytes", None)
    except Exception:
        cap = None
    if not cap:
        cap = 64 * 1024 * 1024  # conservative fallback: assume v7x-sized VMEM
    return int(cap * 0.5), int(cap * 0.75)


def _label_smoothing_kernel(pred_ref, tgt_ref, out_ref, *,
                            confidence, uniform, lse_scale, n_total, tile_n):
    i = pl.program_id(0)

    # Cast the tile to f32 for the LSE math (inputs may be bf16).
    x = pred_ref[...].astype(jnp.float32)                        # (tile_n, C)
    tn, c = x.shape

    m = jnp.max(x, axis=-1, keepdims=True)                       # (tile_n, 1)
    z = x - m
    lse = jnp.log(jnp.sum(jnp.exp(z), axis=-1, keepdims=True))   # (tile_n, 1)

    # Targets: resident (N_pad, 1) VMEM block, sliced per tile (no per-step DMA).
    start = pl.multiple_of(i * tile_n, tile_n)
    tgt = tgt_ref[pl.ds(start, tile_n), :]                        # (tile_n, 1) int32

    # Fused smoothed-CE reduction:
    #   row_loss = scale*lse - sum_c( where(c == tgt, confidence, uniform) * z_c )
    col = jax.lax.broadcasted_iota(jnp.int32, (1, c), 1)          # (1, C), broadcasts
    w = jnp.where(col == tgt, jnp.float32(confidence), jnp.float32(uniform))
    wz = jnp.sum(w * z, axis=-1, keepdims=True)                   # single reduction
    row_loss = jnp.float32(lse_scale) * lse - wz                  # (tile_n, 1)

    # Mask rows past the true batch size (partial last tile reads are junk).
    # Keep this a select (not a multiply) so garbage NaN/Inf cannot propagate.
    row_ids = i * tile_n + jax.lax.broadcasted_iota(jnp.int32, (tn, 1), 0)
    row_loss = jnp.where(row_ids < n_total, row_loss, 0.0)

    # Lane-dense per-tile partial sum: one (8, 128) f32 vreg, unmasked store.
    out_ref[...] = jnp.full((8, 128), jnp.sum(row_loss), dtype=jnp.float32)


def label_smoothing_loss(pred, target, *, classes, smoothing=0.0, tile_n=None):
    """pred: (N, C) float (f32/bf16), target: (N,) int. Returns scalar f32 loss."""
    confidence = 1.0 - smoothing
    # classes == 1 divides by zero in the PyTorch reference too; guard here.
    uniform = smoothing / (classes - 1) if classes > 1 else 0.0
    lse_scale = confidence + (classes - 1) * uniform  # == 1.0 for standard smoothing

    n, c = pred.shape
    assert c == classes
    itemsize = jnp.dtype(pred.dtype).itemsize
    packing = max(8, 32 // max(1, itemsize))          # 8 f32, 16 bf16, 32 int8/fp8

    budget, vmem_limit = _vmem_sizes()
    # Per-row VMEM need: 2x double-buffered input tile + ~4 f32 full-tile temps.
    bytes_per_row = 2 * c * itemsize + 4 * c * 4
    if tile_n is None:
        tile_n = min(budget // max(1, bytes_per_row), 4096)
    tile_n = max(packing, (int(tile_n) // packing) * packing)
    if tile_n >= n:
        tile_n = n                                    # full-extent block is legal
    num_tiles = pl.cdiv(n, tile_n)
    n_pad = num_tiles * tile_n

    tgt2d = target.astype(jnp.int32).reshape(n, 1)
    if n_pad != n:
        tgt2d = jnp.pad(tgt2d, ((0, n_pad - n), (0, 0)))  # keep pl.ds in-bounds

    kernel = functools.partial(
        _label_smoothing_kernel,
        confidence=confidence, uniform=uniform, lse_scale=lse_scale,
        n_total=n, tile_n=tile_n)

    cost = pl.CostEstimate(
        flops=6 * n * c,
        transcendentals=n * c,
        bytes_accessed=n * c * itemsize + n_pad * 4 + num_tiles * 8 * 128 * 4)

    partials = pl.pallas_call(
        kernel,
        out_shape=jax.ShapeDtypeStruct((num_tiles * 8, 128), jnp.float32),
        grid_spec=pltpu.PrefetchScalarGridSpec(
            num_scalar_prefetch=0,
            grid=(num_tiles,),
            in_specs=[
                pl.BlockSpec((tile_n, c), lambda i: (i, 0)),   # logits tile
                pl.BlockSpec((n_pad, 1), lambda i: (0, 0)),    # all targets, DMA'd once
            ],
            out_specs=pl.BlockSpec((8, 128), lambda i: (i, 0)),
        ),
        compiler_params=pltpu.CompilerParams(
            dimension_semantics=("parallel",),   # disjoint per-tile outputs -> safe
            vmem_limit_bytes=int(vmem_limit),
        ),
        cost_estimate=cost,
    )(pred, tgt2d)

    # Final (tiny) reduction over per-tile partials in plain JAX.
    per_tile = partials.reshape(num_tiles, 8, 128)[:, 0, 0]
    return jnp.sum(per_tile) / jnp.float32(n)


if __name__ == "__main__":
    key = jax.random.PRNGKey(0)
    k1, k2 = jax.random.split(key)

    N, C = 20, 128
    smoothing = 0.1

    pred = jax.random.normal(k1, (N, C), dtype=jnp.float32)
    target = jax.random.randint(k2, (N,), 0, C, dtype=jnp.int32)

    # tile_n=8 -> 3 grid steps with a partial last tile: exercises the
    # row-masking and per-tile partial-sum path.
    loss = label_smoothing_loss(pred, target, classes=C, smoothing=smoothing, tile_n=8)
    loss = jax.block_until_ready(loss)

    # plain-JAX reference mirroring the PyTorch module
    logp = jax.nn.log_softmax(pred.astype(jnp.float32), axis=-1)
    true_dist = jnp.full((N, C), smoothing / (C - 1), dtype=jnp.float32)
    true_dist = true_dist.at[jnp.arange(N), target].set(1.0 - smoothing)
    ref = jnp.mean(jnp.sum(-true_dist * logp, axis=-1))

    assert jnp.allclose(loss, ref, atol=1e-4, rtol=1e-4), (loss, ref)

    # Also check the default (auto-tiled, single-tile here) path.
    loss2 = jax.block_until_ready(
        label_smoothing_loss(pred, target, classes=C, smoothing=smoothing))
    assert jnp.allclose(loss2, ref, atol=1e-4, rtol=1e-4), (loss2, ref)

    print("KERNEL_OK")
</pallas_src>

<mosaic_0001>
module attributes {stable_mosaic.version = 11 : i64} {
  func.func @_label_smoothing_kernel(%arg0: i32, %arg1: memref<8x128xf32, #tpu.memory_space<vmem>>, %arg2: memref<24x1xi32, #tpu.memory_space<vmem>>, %arg3: memref<8x128xf32, #tpu.memory_space<vmem>>) attributes {dimension_semantics = [#tpu.dimension_semantics<parallel>], iteration_bounds = array<i64: 3>, scalar_prefetch = 0 : i64, scratch_operands = 0 : i64, tpu.core_type = #tpu.core_type<tc>, window_params = [{transform_indices = @transform_0, window_bounds = array<i64: 8, 128>}, {pipeline_mode = #tpu.pipeline_mode<synchronous>, transform_indices = @transform_1, window_bounds = array<i64: 24, 1>}, {transform_indices = @transform_2, window_bounds = array<i64: 8, 128>}]} {
    %c0 = arith.constant 0 : index
    %c0_0 = arith.constant 0 : index
    %0 = vector.load %arg1[%c0, %c0_0] : memref<8x128xf32, #tpu.memory_space<vmem>>, vector<8x128xf32>
    %cst = arith.constant dense<0xFF800000> : vector<8xf32>
    %1 = vector.multi_reduction <maximumf>, %0, %cst [1] : vector<8x128xf32> to vector<8xf32>
    %2 = vector.shape_cast %1 : vector<8xf32> to vector<8x1xf32>
    %3 = vector.broadcast %2 : vector<8x1xf32> to vector<8x128xf32>
    %4 = arith.subf %0, %3 : vector<8x128xf32>
    %5 = math.exp %4 : vector<8x128xf32>
    %cst_1 = arith.constant dense<0.000000e+00> : vector<8xf32>
    %6 = vector.multi_reduction <add>, %5, %cst_1 [1] : vector<8x128xf32> to vector<8xf32>
    %7 = vector.shape_cast %6 : vector<8xf32> to vector<8x1xf32>
    %8 = math.log %7 : vector<8x1xf32>
    %c8_i32 = arith.constant 8 : i32
    %9 = arith.muli %arg0, %c8_i32 : i32
    %10 = tpu.assume_multiple %9, 8 : i32
    %11 = arith.index_cast %10 : i32 to index
    %c0_2 = arith.constant 0 : index
    %12 = vector.load %arg2[%11, %c0_2] : memref<24x1xi32, #tpu.memory_space<vmem>>, vector<8x1xi32>
    %13 = tpu.iota {dimensions = array<i32: 1>} : vector<1x128xi32>
    %14 = vector.broadcast %13 : vector<1x128xi32> to vector<8x128xi32>
    %15 = vector.broadcast %12 : vector<8x1xi32> to vector<8x128xi32>
    %16 = arith.cmpi eq, %14, %15 : vector<8x128xi32>
    %cst_3 = arith.constant 0.899999976 : f32
    %cst_4 = arith.constant 7.87401571E-4 : f32
    %17 = vector.broadcast %cst_3 : f32 to vector<8x128xf32>
    %18 = vector.broadcast %cst_4 : f32 to vector<8x128xf32>
    %19 = arith.select %16, %17, %18 : vector<8x128xi1>, vector<8x128xf32>
    %20 = arith.mulf %19, %4 : vector<8x128xf32>
    %cst_5 = arith.constant dense<0.000000e+00> : vector<8xf32>
    %21 = vector.multi_reduction <add>, %20, %cst_5 [1] : vector<8x128xf32> to vector<8xf32>
    %22 = vector.shape_cast %21 : vector<8xf32> to vector<8x1xf32>
    %cst_6 = arith.constant 1.000000e+00 : f32
    %23 = vector.broadcast %cst_6 : f32 to vector<8x1xf32>
    %24 = arith.mulf %23, %8 : vector<8x1xf32>
    %25 = arith.subf %24, %22 : vector<8x1xf32>
    %c8_i32_7 = arith.constant 8 : i32
    %26 = arith.muli %arg0, %c8_i32_7 : i32
    %27 = tpu.iota {dimensions = array<i32: 0>} : vector<8x1xi32>
    %28 = vector.broadcast %26 : i32 to vector<8x1xi32>
    %29 = arith.addi %28, %27 : vector<8x1xi32>
    %c20_i32 = arith.constant 20 : i32
    %30 = vector.broadcast %c20_i32 : i32 to vector<8x1xi32>
    %31 = arith.cmpi slt, %29, %30 : vector<8x1xi32>
    %cst_8 = arith.constant 0.000000e+00 : f32
    %32 = vector.broadcast %cst_8 : f32 to vector<8x1xf32>
    %33 = arith.select %31, %25, %32 : vector<8x1xi1>, vector<8x1xf32>
    %34 = vector.shape_cast %33 : vector<8x1xf32> to vector<1x8x1xf32>
    %cst_9 = arith.constant dense<0.000000e+00> : vector<1xf32>
    %35 = vector.multi_reduction <add>, %34, %cst_9 [1, 2] : vector<1x8x1xf32> to vector<1xf32>
    %36 = vector.shape_cast %35 : vector<1xf32> to vector<1x1x1xf32>
    %37 = vector.extract %36[0, 0, 0] : f32 from vector<1x1x1xf32>
    %38 = vector.broadcast %37 : f32 to vector<8x128xf32>
    %c0_10 = arith.constant 0 : index
    %c0_11 = arith.constant 0 : index
    %39 = vector.load %arg3[%c0_10, %c0_11] : memref<8x128xf32, #tpu.memory_space<vmem>>, vector<8x128xf32>
    tpu.vector_store %arg3[%c0_10, %c0_11], %38 {strides = array<i32>} : memref<8x128xf32, #tpu.memory_space<vmem>>, vector<8x128xf32>,
    return
  }
  func.func @transform_0(%arg0: i32) -> (i32, i32) {
    %c0_i32 = arith.constant 0 : i32
    %c0_i32_0 = arith.constant 0 : i32
    return %arg0, %c0_i32 : i32, i32
  }
  func.func @transform_1(%arg0: i32) -> (i32, i32) {
    %c0_i32 = arith.constant 0 : i32
    %c0_i32_0 = arith.constant 0 : i32
    %c0_i32_1 = arith.constant 0 : i32
    return %c0_i32, %c0_i32_0 : i32, i32
  }
  func.func @transform_2(%arg0: i32) -> (i32, i32) {
    %c0_i32 = arith.constant 0 : i32
    %c0_i32_0 = arith.constant 0 : i32
    return %arg0, %c0_i32 : i32, i32
  }
}

</mosaic_0001>

<bundles_post_ra>
// kernel: tpu_custom_call.1
= control target key start
LH: loop header
LB: loop body
LE: loop exit
PB: predicated region body
PF: predicated region fallthrough
CT: control target
= control target key end

     0   :  { %7 = vsyncpa [#allocation3], 0  ;;  %s493_s0 = inlined_call_operand.vmem [shape: f32[20,128], index: 0, kind: input, shape index: {}]   ;;  %s494_s1 = inlined_call_operand.vmem [shape: s32[24,1], index: 1, kind: input, shape index: {}]   ;;  %s495_s2 = inlined_call_operand.hbm [shape: f32[24,128], index: 2, kind: output, shape index: {}]  }
   0x1   :  { %9 = vsyncpa [#allocation3 + $0x1], 0  ;;  %s396_s9 = smov 0   ;;  %s398_s10 = smov 0  }
   0x2   :  { %s400_s11 = smov 0   ;;  %s402_s12 = smov 0  }
   0x3 LB: > { %s417_s13 = sadd.s32 4294967295, %s376_s12   ;;  %s257_s14 = sadd.s32 4294967294, %s376_s12   ;;  %s376_s12 = sphi %s402_s12, %s501_s12   ;;  %s372_s11 = sphi %s400_s11, %s500_s11   ;;  %s368_s10 = sphi %s398_s10, %s499_s10   ;;  %s364_s9 = sphi %s396_s9, %s498_s9  }
   0x4   : > { %s421_s15 = sadd.s32 1, %s376_s12   ;;  %s69_s16 = sadd.s32 1, %s372_s11 }
   0x5   : > { %s66_s17 = ssub.s32 %s376_s12, %s421_s15  ;;  %p79_p0 = scmp.ne.s32.totalorder %s372_s11, %s368_s10 }
   0x6   : > { %p67_p1 = scmp.eq.s32.totalorder %s66_s17, 0  ;;  %p80_p2 = scmp.eq.s32.totalorder %s417_s13, 2 }
   0x7   : > { %p85_p3 = scmp.ne.s32.totalorder %s368_s10, %s364_s9  ;;  %p86_p4 = scmp.eq.s32.totalorder %s257_s14, 2 }
   0x8   : > { %s432_s18 = scalar_select %p67_p1, %s372_s11, %s69_s16  }
   0x9   : > { %p434_p5 = por %p80_p2, %p79_p0  ;;  %p438_p6 = por %p86_p4, %p85_p3 }
   0xa   : > { %p260_p7 = scmp.ge.s32.totalorder %s376_s12, 1  ;;  %p114_p8 = scmp.lt.s32.totalorder %s376_s12, 4 }
   0xc   : > { %p115_p9 = pnand %p260_p7, %p114_p8 }
   0xd   : > { %p135_p10 = scmp.lt.s32.totalorder (!%p115_p9), %s417_s13, 2  ;;  %s263_s26 = sshll.u32 (!%p115_p9), %s417_s13, 3 }
   0xe   : > { %118 = sbr.rel (%p115_p9) target bundleno = 552 (0x228), region = 28  ;;  %s150_s29 = scalar_lea.vmem (!%p115_p9), %s494_s1, %s263_s26 }
   0xf   : > { %s132_s30 = sand.u32 (!%p115_p9), 1, %s368_s10   ;;  %s265_s6 = sshll.u32 (!%p115_p9), %s417_s13, 7 }
  0x10   : > { %s261_s3 = sshll.u32 (!%p115_p9), %s132_s30, 3  ;;  %s194_s16 = scalar_lea.hbm (!%p115_p9), %s495_s2, %s265_s6 }
  0x11   : > { %s134_s4 = scalar_lea.vmem (!%p115_p9), [#allocation2], %s261_s3  ;;  %s183_s17 = scalar_lea.sflag (!%p115_p9), [#allocation3], %s132_s30 }
  0x12   : > { %s196_s5 = sshll.u32 (!%p115_p9), %s134_s4, 4  ;;  %s455_s5 = int_to_ptr.vmem [resolvable:$true] %s196_s5 }
  0x13   : > { %v378_v0 = vmov 0   ;;  %s136_s21 = scalar_select %p135_p10, %s417_s13, 2  ;;  %v151_v2 = vld [vmem:[%s150_s29] sm:$0xff]  ;;  %v152_v6 = vlaneseq  ;;  %v379_v10 = vmov 0.0007874016   ;;  %v165_v15 = vstv %s263_s26 }
  0x14   : > { %311 = vset.pattern.permute.xlu0 %v378_v0  ;;  %vm169_vm2 = vcmask 7168  }
  0x15   : > { %s262_s22 = sshll.u32 %s136_s21, 3  ;;  %v153_v7 = vand.u32 127, %v152_v6  ;;  %v164_v14 = vshrl.u32 %v152_v6, 7  ;;  %s316_s21 = scalar_lea.vmem %s455_s5, 128 }
  0x16   : > { %s138_s25 = scalar_lea.vmem %s493_s0, %s262_s22  ;;  %p317_p11 = scmp.ne.s32.totalorder %s455_s5, %s316_s21 }
  0x17   : > { %v139_v1 = vld [vmem:[%s138_s25] sm:$0xff]  ;;  %v166_v16 = vadd.s32 %v165_v15, %v164_v14  ;;  %s380_s22 = smov [#allocation2]  }
  0x18   : > { %140 = vmax.xlane.f32.xlu0 %v139_v1  ;;  %p318_p12 = pnand %p317_p11, %p434_p5  ;;  %s320_s13 = sshll.u32 %s380_s22, 4  ;;  %s321_s13 = int_to_ptr.vmem [resolvable:$false] %s320_s13 }
  0x19   : > { %vm167_vm1 = vcmp.lt.s32.totalorder %v166_v16, 20  ;;  %s322_s23 = scalar_lea.vmem %s321_s13, 256  ;;  %p323_p0 = scmp.lt.s32.totalorder %s455_s5, %s321_s13 }
  0x1a   : > { %p319_p13 = pneg %p318_p12  ;;  %p324_p1 = scmp.lt.s32.totalorder %s322_s23, %s316_s21 }
  0x1c   : > { %p325_p2 = por %p324_p1, %p323_p0 }
  0x1e   : > { %p326_p3 = pnand %p325_p2, %p319_p13 }
  0x2e   : > { %155 = vperm.xlu0 %311, %v151_v2  }
  0xa1   : > { %v141_v3 = vpop.xlane.xlu0 %140 }
  0xa2   : > { %v142_v4 = vsub.f32 %v139_v1, %v141_v3 }
  0xa4   : > { %v143_v5 = vmul.f32 1.442695, %v142_v4 }
  0xa6   : > { %312 = vpow2.f32 %v143_v5 }
  0xa9   : > { %v156_v8 = vpop.permute.xlu0 %155 }
  0xaa   : > { %vm157_vm0 = vcmp.eq.s32.totalorder %v153_v7, %v156_v8 }
  0xab   : > { %v158_v11 = vsel %vm157_vm0, 0.9, %v379_v10 }
  0xac   : > { %v159_v12 = vmul.f32 %v158_v11, %v142_v4 }
  0xb3   : > { %v313_v9 = vpop.eup %312 }
  0xb4   : > { %145 = vadd.xlane.f32.xlu1 %v313_v9 }
  0xb8   : > { %160 = vadd.xlane.f32.xlu1 %v159_v12 }
 0x13d   : > { %v146_v13 = vpop.xlane.xlu1 %145 }
 0x13e   : > { %314 = vlog2.f32 %v146_v13 }
 0x141   : > { %v161_v19 = vpop.xlane.xlu1 %160 }
 0x14b   : > { %v315_v17 = vpop.eup %314 }
 0x14c   : > { %v148_v18 = vmul.f32 0.6931472, %v315_v17 }
 0x14e   : > { %v162_v20 = vsub.f32 %v148_v18, %v161_v19 }
 0x150   : > { %v168_v21 = vsel %vm167_vm1, %v162_v20, 0.0 }
 0x151   : > { %v170_v22 = vsel %vm169_vm2, %v168_v21, 0.0 }
 0x152   : > { %171 = vadd.xlane.f32.xlu1 %v170_v22 }
 0x1db   : > { %v172_v23 = vpop.xlane.xlu1 %171 }
 0x1dc   : > { %v173_v24 = vrot.slane %v172_v23, 4 }
 0x1de   : > { %v174_v25 = vadd.f32 %v173_v24, %v172_v23 }
 0x1e0   : > { %v175_v26 = vrot.slane %v174_v25, 2 }
 0x1e2   : > { %v176_v27 = vadd.f32 %v175_v26, %v174_v25 }
 0x1e4   : > { %v177_v28 = vrot.slane %v176_v27, 1 }
 0x1e6   : > { %v178_v29 = vadd.f32 %v177_v28, %v176_v27 }
 0x1e8   : > { %268 = vpush %v178_v29 }
 0x219   : > { %s269_s7 = spop %268 }
 0x21a   : > { %v180_v30 = vstv %s269_s7 }
 0x21b   : > { %181 = vst [vmem:[%s134_s4] sm:$0xff] %v180_v30 }
 0x21c   : > { %329 = shalt.err (!%p326_p3)
}
 0x21d   : > { %s330_s24 = scalar_lea.hbm %s194_s16, 128  ;;  %s334_s27 = scalar_lea.hbm %s495_s2, 384 }
 0x21e   : > { %p331_p4 = scmp.ne.s32.totalorder %s194_s16, %s330_s24  ;;  %p335_p9 = scmp.lt.s32.totalorder %s194_s16, %s495_s2 }
 0x21f   : > { %p336_p10 = scmp.lt.s32.totalorder %s334_s27, %s330_s24 }
 0x220   : > { %p332_p7 = pnand %p331_p4, %p434_p5 }
 0x221   : > { %p337_p11 = por %p336_p10, %p335_p9 }
 0x222   : > { %p333_p8 = pneg %p332_p7 }
 0x224   : > { %p338_p12 = pnand %p337_p11, %p333_p8 }
 0x226   : > { %341 = shalt.err (!%p338_p12)
}
 0x227   : > { %270 = dma.vmem_to_hbm [thread:$0]  (%p434_p5), %s455_s5, 128, %s194_s16, %s183_s17  }
 0x228 PF: > { %p276_p13 = scmp.ge.s32.totalorder %s376_s12, 2  ;;  %s208_s30 = sand.u32 1, %s364_s9  }
 0x229   : > { %s209_s3 = scalar_lea.sflag [#allocation3], %s208_s30 }
 0x22a   : > { %p273_p0 = pnand %p276_p13, %p438_p6 }
 0x22c   : > { %p274_p1 = pneg %p273_p0 }
 0x22e   : > { %359 = dma.done.wait (%p274_p1), %s209_s3, 128  }
 0x22f   : > { %361 = vsyncadd (%p274_p1), %s209_s3, 4294967168  ;;  %p12_p2 = scmp.ge.s32.totalorder %s421_s15, 5   ;;  %s498_s9 = smov %s368_s10 }
 0x230   : > { %s499_s10 = smov %s372_s11  ;;  %s500_s11 = smov %s432_s18 }
 0x231   : > { %s501_s12 = smov %s421_s15  ;;  %14 = sbr.rel (!%p12_p2) target bundleno = 3 (0x3), region = 64 }
 0x236   :  { %214 = vsyncpa [#allocation3], 1 }
 0x237   :  { %216 = vsyncpa [#allocation3 + $0x1], 1 }

</bundles_post_ra>
